<compile_context>
chip_gen: v7x
topology: tpu7x:2x2x1
jax: 0.10.0
libtpu: 0.0.40
codegen_flags: <defaults>
</compile_context>

<pallas_src>
import jax
import jax.numpy as jnp
from jax.experimental import pallas as pl
from jax.experimental.pallas import tpu as pltpu


def siamese_kernel(q_ref, s_ref, w1q_ref, w1s_ref, b1_ref, w2_ref, b2_ref,
                   w3rep_ref, b3_ref, o_ref):
    bf16 = jnp.bfloat16

    # ----- Layer 1: Linear(2E -> 128) without the concat ---------------------
    # concat([q, s], -1) @ W1  ==  q @ W1[:E] + s @ W1[E:]
    # Inputs arrive f32 (single HBM read, no wrapper bf16 copy); cast here.
    h1 = jnp.dot(q_ref[...].astype(bf16), w1q_ref[...],
                 preferred_element_type=jnp.float32)
    h1 = h1 + jnp.dot(s_ref[...].astype(bf16), w1s_ref[...],
                      preferred_element_type=jnp.float32)
    h1 = jnp.maximum(h1 + b1_ref[...], 0.0)                     # [TB, 128] f32
    # Dropout(0.5): identity in eval mode.

    # ----- Layer 2: Linear(128 -> 64) + ReLU ----------------------------------
    h2 = jnp.dot(h1.astype(bf16), w2_ref[...],
                 preferred_element_type=jnp.float32)
    h2 = jnp.maximum(h2 + b2_ref[...], 0.0)                      # [TB, 64] f32
    # Dropout(0.5): identity in eval mode.

    # ----- Layer 3: Linear(64 -> 1) + Sigmoid, written lane-dense -------------
    # W3 is replicated across 128 lanes, so z_slab[r, c] == z[r] for every c.
    # Kept in f32 (K=64 reduction) for tighter parity with the f32 reference.
    z_slab = jnp.dot(h2, w3rep_ref[...],
                     preferred_element_type=jnp.float32)         # [TB, 128] f32

    # Extract the per-128-row diagonal so the result for batch row g*128 + c
    # lands at (sublane g, lane c): a dense [G, 128] tile -> 4 B/row to HBM.
    rows = jax.lax.broadcasted_iota(jnp.int32, (128, 128), 0)
    cols = jax.lax.broadcasted_iota(jnp.int32, (128, 128), 1)
    eye = rows == cols
    G = o_ref.shape[0]                       # static: TB // 128
    for g in range(G):
        blk = z_slab[g * 128:(g + 1) * 128, :]                   # [128, 128]
        # jnp.where (not multiply-by-eye) so garbage rows of a padded/partial
        # tile cannot leak NaNs into valid lanes.
        zg = jnp.sum(jnp.where(eye, blk, 0.0), axis=0)           # [128], lanes
        o_ref[g, :] = jax.nn.sigmoid(zg + b3_ref[0])


def _vmem_limit_bytes():
    """~75% of this generation's per-core VMEM (48 MiB v7x, 96 MiB v5e/v6e)."""
    try:
        cap = pltpu.get_tpu_info().vmem_capacity_bytes
        return int(min(max(cap * 3 // 4, 48 * 1024 * 1024), 112 * 1024 * 1024))
    except Exception:
        return 48 * 1024 * 1024


def siamese_forward(query, snippet, params, *, block_batch=2048):
    """Eval-mode forward pass. Returns sigmoid scores of shape [B, 1].

    block_batch = batch rows per grid step (multiple of 128; multiples of 1024
    are required when more than one tile is needed).  Guidance: 2048-8192 on
    v5e/v6e, 2048-4096 on v7x -- and on v7x prefer a value giving >= 2 grid
    steps so both TensorCores get work.  Choose block_batch dividing the
    production batch so the ragged-tail pad below never triggers.
    """
    w1, b1, w2, b2, w3, b3 = params
    B, E = query.shape

    # --- tile-size selection ---------------------------------------------------
    B128 = ((B + 127) // 128) * 128                # batch rounded to lane width
    TB = max(128, (min(int(block_batch), B128) // 128) * 128)
    if TB < B128 and TB % 1024 != 0:
        # Multi-tile case needs G = TB/128 divisible by 8 so the lane-dense
        # output block obeys the (8, 128) rule; round up (may become 1 tile).
        TB = min(((TB + 1023) // 1024) * 1024, B128)
    G = TB // 128
    n_tiles = pl.cdiv(B, TB)
    B_pad = n_tiles * TB

    if B_pad != B:
        # NOTE: jnp.pad copies the whole input -- only acceptable when B is
        # small or B % TB == 0 can't be arranged by the caller.
        pad = B_pad - B
        query = jnp.pad(query, ((0, pad), (0, 0)))
        snippet = jnp.pad(snippet, ((0, pad), (0, 0)))

    # --- small one-time weight preprocessing (weights are tiny) ---------------
    w1q = w1[:E].astype(jnp.bfloat16)              # [E, 128]
    w1s = w1[E:].astype(jnp.bfloat16)              # [E, 128]
    w2_bf = w2.astype(jnp.bfloat16)                # [128, 64]
    b1_r = b1.reshape(1, 128).astype(jnp.float32)
    b2_r = b2.reshape(1, 64).astype(jnp.float32)
    w3rep = jnp.broadcast_to(w3.reshape(64, 1).astype(jnp.float32), (64, 128))
    b3_r = b3.reshape(1).astype(jnp.float32)       # scalar bias -> SMEM

    tile = lambda i: (i, 0)      # batch-tiled arrays
    const = lambda i: (0, 0)     # weights/biases resident across the grid

    flops = 2 * B_pad * (2 * E * 128 + 128 * 64 + 64 * 128)
    bytes_accessed = (8 * B_pad * E          # q + s (f32)
                      + 4 * B_pad            # lane-dense output (f32)
                      + 2 * (2 * E * 128 + 128 * 64)   # bf16 weights
                      + 4 * (64 * 128 + 128 + 64 + 1))  # f32 weights/biases

    out = pl.pallas_call(
        siamese_kernel,
        out_shape=jax.ShapeDtypeStruct((n_tiles * G, 128), jnp.float32),
        grid=(n_tiles,),
        in_specs=[
            pl.BlockSpec((TB, E), tile),                         # query tile f32
            pl.BlockSpec((TB, E), tile),                         # snippet tile f32
            pl.BlockSpec((E, 128), const),                       # W1[:E]  bf16
            pl.BlockSpec((E, 128), const),                       # W1[E:]  bf16
            pl.BlockSpec((1, 128), const),                       # b1      f32
            pl.BlockSpec((128, 64), const),                      # W2      bf16
            pl.BlockSpec((1, 64), const),                        # b2      f32
            pl.BlockSpec((64, 128), const),                      # W3 replicated f32
            pl.BlockSpec(memory_space=pltpu.MemorySpace.SMEM),   # b3 scalar
        ],
        out_specs=pl.BlockSpec((G, 128), tile),
        compiler_params=pltpu.CompilerParams(
            dimension_semantics=("parallel",),   # shard batch tiles across TCs
            vmem_limit_bytes=_vmem_limit_bytes(),
        ),
        cost_estimate=pl.CostEstimate(
            flops=flops, transcendentals=B_pad,
            bytes_accessed=int(bytes_accessed)),
    )(query, snippet, w1q, w1s, b1_r, w2_bf, b2_r, w3rep, b3_r)

    # out[g, c] holds the score of batch row g*128 + c; drop padded rows.
    return out.reshape(B_pad, 1)[:B]


def init_params(key, embedding_dim):
    """nn.Linear-style U[-1/sqrt(fan_in), +] init. Weights stored [in, out]."""
    def linear(k, fan_in, fan_out):
        kw, kb = jax.random.split(k)
        bound = 1.0 / jnp.sqrt(jnp.float32(fan_in))
        w = jax.random.uniform(kw, (fan_in, fan_out), jnp.float32, -bound, bound)
        b = jax.random.uniform(kb, (fan_out,), jnp.float32, -bound, bound)
        return w, b

    k1, k2, k3 = jax.random.split(key, 3)
    w1, b1 = linear(k1, embedding_dim * 2, 128)
    w2, b2 = linear(k2, 128, 64)
    w3, b3 = linear(k3, 64, 1)
    return (w1, b1, w2, b2, w3, b3)


def reference_forward(q, s, params):
    """Pure-JAX reference matching the kernel's bf16-input / f32-accum numerics."""
    w1, b1, w2, b2, w3, b3 = params
    E = q.shape[-1]
    bf = jnp.bfloat16
    h1 = (jnp.dot(q.astype(bf), w1[:E].astype(bf),
                  preferred_element_type=jnp.float32)
          + jnp.dot(s.astype(bf), w1[E:].astype(bf),
                    preferred_element_type=jnp.float32)
          + b1)
    h1 = jnp.maximum(h1, 0.0)
    h2 = jnp.dot(h1.astype(bf), w2.astype(bf),
                 preferred_element_type=jnp.float32) + b2
    h2 = jnp.maximum(h2, 0.0)
    z = h2 @ w3 + b3
    return jax.nn.sigmoid(z)


if __name__ == "__main__":
    embedding_dim = 32   # small synthetic stand-in for MiniLM's 384
    batch = 8

    key = jax.random.PRNGKey(0)
    kq, ks, kp = jax.random.split(key, 3)
    q = jax.random.normal(kq, (batch, embedding_dim), jnp.float32)
    s = jax.random.normal(ks, (batch, embedding_dim), jnp.float32)
    params = init_params(kp, embedding_dim)

    out = siamese_forward(q, s, params)     # TB auto-clamps to 128 for B=8
    out = jax.block_until_ready(out)

    ref = reference_forward(q, s, params)
    assert out.shape == (batch, 1)
    assert jnp.allclose(out, ref, atol=1e-3, rtol=1e-3), "mismatch vs JAX reference"

    print("KERNEL_OK")
</pallas_src>

<mosaic_0001>
module attributes {stable_mosaic.version = 11 : i64} {
  func.func @siamese_kernel(%arg0: i32, %arg1: memref<128x32xf32, #tpu.memory_space<vmem>>, %arg2: memref<128x32xf32, #tpu.memory_space<vmem>>, %arg3: memref<32x128xbf16, #tpu.memory_space<vmem>>, %arg4: memref<32x128xbf16, #tpu.memory_space<vmem>>, %arg5: memref<1x128xf32, #tpu.memory_space<vmem>>, %arg6: memref<128x64xbf16, #tpu.memory_space<vmem>>, %arg7: memref<1x64xf32, #tpu.memory_space<vmem>>, %arg8: memref<64x128xf32, #tpu.memory_space<vmem>>, %arg9: memref<1xf32, #tpu.memory_space<smem>>, %arg10: memref<1x128xf32, #tpu.memory_space<vmem>>) attributes {dimension_semantics = [#tpu.dimension_semantics<parallel>], iteration_bounds = array<i64: 1>, scalar_prefetch = 0 : i64, scratch_operands = 0 : i64, tpu.core_type = #tpu.core_type<tc>, window_params = [{transform_indices = @transform_0, window_bounds = array<i64: 128, 32>}, {transform_indices = @transform_1, window_bounds = array<i64: 128, 32>}, {pipeline_mode = #tpu.pipeline_mode<synchronous>, transform_indices = @transform_2, window_bounds = array<i64: 32, 128>}, {pipeline_mode = #tpu.pipeline_mode<synchronous>, transform_indices = @transform_3, window_bounds = array<i64: 32, 128>}, {pipeline_mode = #tpu.pipeline_mode<synchronous>, transform_indices = @transform_4, window_bounds = array<i64: 1, 128>}, {pipeline_mode = #tpu.pipeline_mode<synchronous>, transform_indices = @transform_5, window_bounds = array<i64: 128, 64>}, {pipeline_mode = #tpu.pipeline_mode<synchronous>, transform_indices = @transform_6, window_bounds = array<i64: 1, 64>}, {pipeline_mode = #tpu.pipeline_mode<synchronous>, transform_indices = @transform_7, window_bounds = array<i64: 64, 128>}, {transform_indices = @transform_8, window_bounds = array<i64: 1>}, {transform_indices = @transform_9, window_bounds = array<i64: 1, 128>}]} {
    %c0 = arith.constant 0 : index
    %c0_0 = arith.constant 0 : index
    %0 = vector.load %arg1[%c0, %c0_0] : memref<128x32xf32, #tpu.memory_space<vmem>>, vector<128x32xf32>
    %1 = arith.truncf %0 : vector<128x32xf32> to vector<128x32xbf16>
    %c0_1 = arith.constant 0 : index
    %c0_2 = arith.constant 0 : index
    %2 = vector.load %arg3[%c0_1, %c0_2] : memref<32x128xbf16, #tpu.memory_space<vmem>>, vector<32x128xbf16>
    %cst = arith.constant dense<0.000000e+00> : vector<128x128xf32>
    %3 = tpu.matmul %1, %2, %cst {dimension_numbers = #tpu.dot_dimension_numbers<[1], [0], [0], [1], [0, 0, 1, 1], [], []>} : vector<128x32xbf16>, vector<32x128xbf16>, vector<128x128xf32> -> vector<128x128xf32>
    %c0_3 = arith.constant 0 : index
    %c0_4 = arith.constant 0 : index
    %4 = vector.load %arg2[%c0_3, %c0_4] : memref<128x32xf32, #tpu.memory_space<vmem>>, vector<128x32xf32>
    %5 = arith.truncf %4 : vector<128x32xf32> to vector<128x32xbf16>
    %c0_5 = arith.constant 0 : index
    %c0_6 = arith.constant 0 : index
    %6 = vector.load %arg4[%c0_5, %c0_6] : memref<32x128xbf16, #tpu.memory_space<vmem>>, vector<32x128xbf16>
    %cst_7 = arith.constant dense<0.000000e+00> : vector<128x128xf32>
    %7 = tpu.matmul %5, %6, %cst_7 {dimension_numbers = #tpu.dot_dimension_numbers<[1], [0], [0], [1], [0, 0, 1, 1], [], []>} : vector<128x32xbf16>, vector<32x128xbf16>, vector<128x128xf32> -> vector<128x128xf32>
    %8 = arith.addf %3, %7 : vector<128x128xf32>
    %c0_8 = arith.constant 0 : index
    %c0_9 = arith.constant 0 : index
    %9 = vector.load %arg5[%c0_8, %c0_9] : memref<1x128xf32, #tpu.memory_space<vmem>>, vector<1x128xf32>
    %10 = vector.broadcast %9 : vector<1x128xf32> to vector<128x128xf32>
    %11 = arith.addf %8, %10 : vector<128x128xf32>
    %cst_10 = arith.constant 0.000000e+00 : f32
    %12 = vector.broadcast %cst_10 : f32 to vector<128x128xf32>
    %13 = arith.maximumf %11, %12 : vector<128x128xf32>
    %14 = arith.truncf %13 : vector<128x128xf32> to vector<128x128xbf16>
    %c0_11 = arith.constant 0 : index
    %c0_12 = arith.constant 0 : index
    %15 = vector.load %arg6[%c0_11, %c0_12] : memref<128x64xbf16, #tpu.memory_space<vmem>>, vector<128x64xbf16>
    %cst_13 = arith.constant dense<0.000000e+00> : vector<128x64xf32>
    %16 = tpu.matmul %14, %15, %cst_13 {dimension_numbers = #tpu.dot_dimension_numbers<[1], [0], [0], [1], [0, 0, 1, 1], [], []>} : vector<128x128xbf16>, vector<128x64xbf16>, vector<128x64xf32> -> vector<128x64xf32>
    %c0_14 = arith.constant 0 : index
    %c0_15 = arith.constant 0 : index
    %17 = vector.load %arg7[%c0_14, %c0_15] : memref<1x64xf32, #tpu.memory_space<vmem>>, vector<1x64xf32>
    %18 = vector.broadcast %17 : vector<1x64xf32> to vector<128x64xf32>
    %19 = arith.addf %16, %18 : vector<128x64xf32>
    %cst_16 = arith.constant 0.000000e+00 : f32
    %20 = vector.broadcast %cst_16 : f32 to vector<128x64xf32>
    %21 = arith.maximumf %19, %20 : vector<128x64xf32>
    %c0_17 = arith.constant 0 : index
    %c0_18 = arith.constant 0 : index
    %22 = vector.load %arg8[%c0_17, %c0_18] : memref<64x128xf32, #tpu.memory_space<vmem>>, vector<64x128xf32>
    %cst_19 = arith.constant dense<0.000000e+00> : vector<128x128xf32>
    %23 = tpu.matmul %21, %22, %cst_19 {dimension_numbers = #tpu.dot_dimension_numbers<[1], [0], [0], [1], [0, 0, 1, 1], [], []>} : vector<128x64xf32>, vector<64x128xf32>, vector<128x128xf32> -> vector<128x128xf32>
    %24 = tpu.iota {dimensions = array<i32: 0>} : vector<128x128xi32>
    %25 = tpu.iota {dimensions = array<i32: 1>} : vector<128x128xi32>
    %26 = arith.cmpi eq, %24, %25 : vector<128x128xi32>
    %cst_20 = arith.constant 0.000000e+00 : f32
    %27 = vector.broadcast %cst_20 : f32 to vector<128x128xf32>
    %28 = arith.select %26, %23, %27 : vector<128x128xi1>, vector<128x128xf32>
    %cst_21 = arith.constant dense<0.000000e+00> : vector<128xf32>
    %29 = vector.multi_reduction <add>, %28, %cst_21 [0] : vector<128x128xf32> to vector<128xf32>
    %c0_22 = arith.constant 0 : index
    %30 = memref.load %arg9[%c0_22] : memref<1xf32, #tpu.memory_space<smem>>
    %31 = vector.broadcast %30 : f32 to vector<128xf32>
    %32 = arith.addf %29, %31 : vector<128xf32>
    %33 = arith.negf %32 : vector<128xf32>
    %34 = math.exp %33 : vector<128xf32>
    %cst_23 = arith.constant 1.000000e+00 : f32
    %35 = vector.broadcast %cst_23 : f32 to vector<128xf32>
    %36 = arith.addf %35, %34 : vector<128xf32>
    %37 = arith.divf %35, %36 : vector<128xf32>
    %c0_24 = arith.constant 0 : index
    %c0_25 = arith.constant 0 : index
    %38 = vector.load %arg10[%c0_24, %c0_25] : memref<1x128xf32, #tpu.memory_space<vmem>>, vector<1x128xf32>
    %39 = vector.shape_cast %38 : vector<1x128xf32> to vector<128xf32>
    %40 = vector.shape_cast %37 : vector<128xf32> to vector<1x128xf32>
    tpu.vector_store %arg10[%c0_24, %c0_25], %40 {strides = array<i32>} : memref<1x128xf32, #tpu.memory_space<vmem>>, vector<1x128xf32>,
    return
  }
  func.func @transform_0(%arg0: i32) -> (i32, i32) {
    %c0_i32 = arith.constant 0 : i32
    %c0_i32_0 = arith.constant 0 : i32
    return %arg0, %c0_i32 : i32, i32
  }
  func.func @transform_1(%arg0: i32) -> (i32, i32) {
    %c0_i32 = arith.constant 0 : i32
    %c0_i32_0 = arith.constant 0 : i32
    return %arg0, %c0_i32 : i32, i32
  }
  func.func @transform_2(%arg0: i32) -> (i32, i32) {
    %c0_i32 = arith.constant 0 : i32
    %c0_i32_0 = arith.constant 0 : i32
    %c0_i32_1 = arith.constant 0 : i32
    return %c0_i32, %c0_i32_0 : i32, i32
  }
  func.func @transform_3(%arg0: i32) -> (i32, i32) {
    %c0_i32 = arith.constant 0 : i32
    %c0_i32_0 = arith.constant 0 : i32
    %c0_i32_1 = arith.constant 0 : i32
    return %c0_i32, %c0_i32_0 : i32, i32
  }
  func.func @transform_4(%arg0: i32) -> (i32, i32) {
    %c0_i32 = arith.constant 0 : i32
    %c0_i32_0 = arith.constant 0 : i32
    %c0_i32_1 = arith.constant 0 : i32
    return %c0_i32, %c0_i32_0 : i32, i32
  }
  func.func @transform_5(%arg0: i32) -> (i32, i32) {
    %c0_i32 = arith.constant 0 : i32
    %c0_i32_0 = arith.constant 0 : i32
    %c0_i32_1 = arith.constant 0 : i32
    return %c0_i32, %c0_i32_0 : i32, i32
  }
  func.func @transform_6(%arg0: i32) -> (i32, i32) {
    %c0_i32 = arith.constant 0 : i32
    %c0_i32_0 = arith.constant 0 : i32
    %c0_i32_1 = arith.constant 0 : i32
    return %c0_i32, %c0_i32_0 : i32, i32
  }
  func.func @transform_7(%arg0: i32) -> (i32, i32) {
    %c0_i32 = arith.constant 0 : i32
    %c0_i32_0 = arith.constant 0 : i32
    %c0_i32_1 = arith.constant 0 : i32
    return %c0_i32, %c0_i32_0 : i32, i32
  }
  func.func @transform_8(%arg0: i32) -> i32 {
    %c0_i32 = arith.constant 0 : i32
    %c0_i32_0 = arith.constant 0 : i32
    return %c0_i32 : i32
  }
  func.func @transform_9(%arg0: i32) -> (i32, i32) {
    %c0_i32 = arith.constant 0 : i32
    %c0_i32_0 = arith.constant 0 : i32
    return %arg0, %c0_i32 : i32, i32
  }
}

</mosaic_0001>

<bundles_post_ra>
// kernel: tpu_custom_call.1
= control target key start
LH: loop header
LB: loop body
LE: loop exit
PB: predicated region body
PF: predicated region fallthrough
CT: control target
= control target key end

     0   :  { %vm103_vm0 = vcmask 261120   ;;  %s1483_s0 = inlined_call_operand.vmem [shape: f32[128,32], index: 0, kind: input, shape index: {}]   ;;  %s1484_s1 = inlined_call_operand.vmem [shape: f32[128,32], index: 1, kind: input, shape index: {}]   ;;  %s1485_s2 = inlined_call_operand.vmem [shape: bf16[32,128], index: 2, kind: input, shape index: {}]   ;;  %s1486_s3 = inlined_call_operand.vmem [shape: bf16[32,128], index: 3, kind: input, shape index: {}]   ;;  %s1487_s4 = inlined_call_operand.vmem [shape: f32[1,128], index: 4, kind: input, shape index: {}]   ;;  %s1488_s5 = inlined_call_operand.vmem [shape: bf16[128,64], index: 5, kind: input, shape index: {}]   ;;  %s1489_s6 = inlined_call_operand.vmem [shape: f32[1,64], index: 6, kind: input, shape index: {}]   ;;  %s1490_s7 = inlined_call_operand.vmem [shape: f32[64,128], index: 7, kind: input, shape index: {}]   ;;  %s1491_s8 = inlined_call_operand.<no memory space> [shape: f32[1], index: 8, kind: input, shape index: {}]   ;;  %s1492_s9 = inlined_call_operand.hbm [shape: f32[1,128], index: 9, kind: output, shape index: {}]  }
   0x1   :  { %v1147_v0 = vld [vmem:[%s1486_s3] sm:$0xff]   ;;  %v1148_v1 = vld [vmem:[%s1486_s3 + $0x8] sm:$0xff]   ;;  %v65_v4 = vld [vmem:[%s1484_s1 + $0x10] sm:$0xff] }
   0x2   :  { %994 = vmatprep.subr.bf16.mxu0 %v1147_v0  ;;  %v63_v2 = vld [vmem:[%s1484_s1] sm:$0xff]  ;;  %v64_v3 = vld [vmem:[%s1484_s1 + $0x8] sm:$0xff]  ;;  %v66_v6 = vld [vmem:[%s1484_s1 + $0x18] sm:$0xff] }
   0x3   :  { %995 = vmatpush3.bf16.msra.mxu0 %v1147_v0  ;;  %v79_v5 = vpack.c.bf16 %v64_v3, %v63_v2  ;;  %v1149_v7 = vld [vmem:[%s1485_s2] sm:$0xff]   ;;  %v68_v9 = vld [vmem:[%s1484_s1 + $0x28] sm:$0xff]  ;;  %v80_v10 = vpack.c.bf16 %v66_v6, %v65_v4  ;;  %v69_v13 = vld [vmem:[%s1484_s1 + $0x30] sm:$0xff] }
   0x4   :  { %996 = vmatprep.subr.bf16.mxu0 %v1148_v1  ;;  %v67_v8 = vld [vmem:[%s1484_s1 + $0x20] sm:$0xff]  ;;  %v1150_v12 = vld [vmem:[%s1485_s2 + $0x8] sm:$0xff]   ;;  %v70_v14 = vld [vmem:[%s1484_s1 + $0x38] sm:$0xff] }
   0x5   :  { %998 = vmatprep.mubr.msk.bf16.mxu0 %vm103_vm0, %v79_v5  ;;  %v81_v11 = vpack.c.bf16 %v68_v9, %v67_v8  ;;  %v71_v15 = vld [vmem:[%s1484_s1 + $0x40] sm:$0xff]  ;;  %v72_v16 = vld [vmem:[%s1484_s1 + $0x48] sm:$0xff]  ;;  %v82_v17 = vpack.c.bf16 %v70_v14, %v69_v13  ;;  %v73_v21 = vld [vmem:[%s1484_s1 + $0x50] sm:$0xff] }
   0x6   :  { %v83_v18 = vpack.c.bf16 %v72_v16, %v71_v15  ;;  %v1151_v19 = vld [vmem:[%s1488_s5] sm:$0xff]   ;;  %v1152_v20 = vld [vmem:[%s1488_s5 + $0x8] sm:$0xff]   ;;  %v74_v22 = vld [vmem:[%s1484_s1 + $0x58] sm:$0xff] }
   0x7   :  { %997 = vmatpush3.bf16.msra.mxu0 %v1148_v1  ;;  %1034 = vmatprep.subr.bf16.mxu1 %v1151_v19  ;;  %v75_v23 = vld [vmem:[%s1484_s1 + $0x60] sm:$0xff]  ;;  %v1153_v24 = vld [vmem:[%s1488_s5 + $0x10] sm:$0xff]   ;;  %v76_v25 = vld [vmem:[%s1484_s1 + $0x68] sm:$0xff]  ;;  %v84_v26 = vpack.c.bf16 %v74_v22, %v73_v21 }
   0x8   :  { %1014 = vmatprep.subr.bf16.mxu0 %v1149_v7  ;;  %1035 = vmatpush3.bf16.msra.mxu1 %v1151_v19 }
   0x9   :  { %1036 = vmatprep.subr.bf16.mxu1 %v1152_v20 }
   0xa   :  { %999 = vmatmul.mubr.msk.bf16.vlgmr.msra.gmra.mrb[0].mxu0 %vm103_vm0, %v80_v10 }
   0xb   :  { %1015 = vmatpush3.bf16.msra.mxu0 %v1149_v7  ;;  %1002 = vmatprep.mubr.msk.bf16.mxu0 %vm103_vm0, %v81_v11 }
   0xc   :  { %1016 = vmatprep.subr.bf16.mxu0 %v1150_v12  ;;  %1037 = vmatpush3.bf16.msra.mxu1 %v1152_v20 }
   0xf   :  { %1017 = vmatpush3.bf16.msra.mxu0 %v1150_v12 }
  0x12   :  { %1003 = vmatmul.mubr.msk.bf16.gmra.mrb[4].mxu0 %vm103_vm0, %v82_v17 }
  0x13   :  { %1006 = vmatprep.mubr.msk.bf16.mxu0 %vm103_vm0, %v83_v18 }
  0x14   :  { %15 = vsyncpa [#allocation4], 0  ;;  %v85_v27 = vpack.c.bf16 %v76_v25, %v75_v23  ;;  %1038 = vmatprep.subr.bf16.mxu1 %v1153_v24  ;;  %v1154_v28 = vld [vmem:[%s1488_s5 + $0x18] sm:$0xff]   ;;  %v77_v29 = vld [vmem:[%s1484_s1 + $0x70] sm:$0xff]  ;;  %vm597_vm1 = vcmask 523264   ;;  %s1187_s19 = smov [#allocation3]  }
  0x15   :  { %1039 = vmatpush3.bf16.msra.mxu1 %v1153_v24  ;;  %v78_v30 = vld [vmem:[%s1484_s1 + $0x78] sm:$0xff]  ;;  %v1155_v31 = vld [vmem:[%s1488_s5 + $0x20] sm:$0xff]   ;;  %v36_v33 = vld [vmem:[%s1483_s0 + $0x8] sm:$0xff]  ;;  %s879_s20 = sshll.u32 %s1187_s19, 4  ;;  %s880_s20 = int_to_ptr.vmem [resolvable:$true] %s879_s20 }
  0x16   :  { %1040 = vmatprep.subr.bf16.mxu1 %v1154_v28  ;;  %v35_v32 = vld [vmem:[%s1483_s0] sm:$0xff]  ;;  %v86_v34 = vpack.c.bf16 %v78_v30, %v77_v29  ;;  %v1156_v36 = vld [vmem:[%s1488_s5 + $0x28] sm:$0xff]   ;;  %v37_v37 = vld [vmem:[%s1483_s0 + $0x10] sm:$0xff]  ;;  %s1163_s3 = scalar_lea.vmem %s880_s20, 16  ;;  %s1167_s21 = scalar_lea.vmem %s880_s20, 32 }
  0x17   :  { %v51_v35 = vpack.c.bf16 %v36_v33, %v35_v32  ;;  %v38_v38 = vld [vmem:[%s1483_s0 + $0x18] sm:$0xff]  ;;  %v39_v39 = vld [vmem:[%s1483_s0 + $0x20] sm:$0xff]  ;;  %v40_v40 = vld [vmem:[%s1483_s0 + $0x28] sm:$0xff]  ;;  %p1164_p0 = scmp.ne.s32.totalorder %s880_s20, %s1163_s3  ;;  %p1168_p1 = scmp.lt.s32.totalorder %s880_s20, %s880_s20 }
  0x18   :  { %v52_v41 = vpack.c.bf16 %v38_v38, %v37_v37  ;;  %v53_v42 = vpack.c.bf16 %v40_v40, %v39_v39  ;;  %v41_v43 = vld [vmem:[%s1483_s0 + $0x30] sm:$0xff]  ;;  %v42_v44 = vld [vmem:[%s1483_s0 + $0x38] sm:$0xff]  ;;  %v43_v45 = vld [vmem:[%s1483_s0 + $0x40] sm:$0xff]  ;;  %p1169_p2 = scmp.lt.s32.totalorder %s1167_s21, %s1163_s3 }
  0x19   :  { %1041 = vmatpush3.bf16.msra.mxu1 %v1154_v28  ;;  %v44_v46 = vld [vmem:[%s1483_s0 + $0x48] sm:$0xff]  ;;  %v54_v47 = vpack.c.bf16 %v42_v44, %v41_v43  ;;  %v45_v49 = vld [vmem:[%s1483_s0 + $0x50] sm:$0xff]  ;;  %v46_v50 = vld [vmem:[%s1483_s0 + $0x58] sm:$0xff] }
  0x1a   :  { %1007 = vmatmul.mubr.msk.bf16.gmra.mrb[8].mxu0 %vm103_vm0, %v84_v26  ;;  %1042 = vmatprep.subr.bf16.mxu1 %v1155_v31  ;;  %v55_v48 = vpack.c.bf16 %v44_v46, %v43_v45  ;;  %v47_v51 = vld [vmem:[%s1483_s0 + $0x60] sm:$0xff]  ;;  %v48_v52 = vld [vmem:[%s1483_s0 + $0x68] sm:$0xff]  ;;  %v56_v53 = vpack.c.bf16 %v46_v50, %v45_v49  ;;  %v49_v55 = vld [vmem:[%s1483_s0 + $0x70] sm:$0xff]  ;;  %p1170_p3 = por %p1169_p2, %p1168_p1 }
  0x1b   :  { %1010 = vmatprep.mubr.msk.bf16.mxu0 %vm103_vm0, %v85_v27  ;;  %v57_v54 = vpack.c.bf16 %v48_v52, %v47_v51  ;;  %v50_v56 = vld [vmem:[%s1483_s0 + $0x78] sm:$0xff]  ;;  %v1157_v58 = vld [vmem:[%s1488_s5 + $0x30] sm:$0xff]   ;;  %v589_v60 = vld [vmem:[%s1490_s7] sm:$0xff] }
  0x1c   :  { %v58_v57 = vpack.c.bf16 %v50_v56, %v49_v55  ;;  %v1158_v59 = vld [vmem:[%s1488_s5 + $0x38] sm:$0xff]   ;;  %v590_v61 = vld [vmem:[%s1490_s7 + $0x8] sm:$0xff]  ;;  %v591_v62 = vld [vmem:[%s1490_s7 + $0x10] sm:$0xff]  ;;  %p1171_p4 = pnand %p1170_p3, %p1164_p0 }
  0x1d   :  { %1043 = vmatpush3.bf16.msra.mxu1 %v1155_v31  ;;  %v1106_v63 = vpack.c.bf16 %v590_v61, %v589_v60  ;;  %v592_v0 = vld [vmem:[%s1490_s7 + $0x18] sm:$0xff]  ;;  %v593_v2 = vld [vmem:[%s1490_s7 + $0x20] sm:$0xff]  ;;  %v594_v3 = vld [vmem:[%s1490_s7 + $0x28] sm:$0xff] }
  0x1e   :  { %1044 = vmatprep.subr.bf16.mxu1 %v1156_v36  ;;  %v1110_v1 = vpack.c.bf16 %v592_v0, %v591_v62  ;;  %v1114_v4 = vpack.c.bf16 %v594_v3, %v593_v2  ;;  %v907_v5 = vld [vmem:[%s1487_s4] ss:$0 sm:$0xff]  ;;  %v595_v62 = vld [vmem:[%s1490_s7 + $0x30] sm:$0xff] }
  0x1f   :  { %1107 = vmatprep.subr.bf16.mxu0 %v1106_v63 }
  0x21   :  { %1045 = vmatpush3.bf16.msra.mxu1 %v1156_v36 }
  0x22   :  { %1011 = vmatmul.mubr.msk.bf16.gmra.mrb[12].mxu0 %vm103_vm0, %v86_v34  ;;  %1046 = vmatprep.subr.bf16.mxu1 %v1157_v58 }
  0x23   :  { %1018 = vmatprep.mubr.msk.bf16.mxu0 %vm103_vm0, %v51_v35 }
  0x25   :  { %1047 = vmatpush3.bf16.msra.mxu1 %v1157_v58 }
  0x26   :  { %1048 = vmatprep.subr.bf16.mxu1 %v1158_v59 }
  0x29   :  { %1049 = vmatpush3.bf16.msra.mxu1 %v1158_v59 }
  0x2a   :  { %1019 = vmatmul.mubr.msk.bf16.vlgmr.msra.gmra.mrb[0].mxu0 %vm103_vm0, %v52_v41  ;;  %1122 = vmatprep.subr.bf16.mxu1 %v1106_v63 }
  0x2b   :  { %1022 = vmatprep.mubr.msk.bf16.mxu0 %vm103_vm0, %v53_v42  ;;  %1109 = vmatpush3.bf16.msra.mxu0 %v1106_v63 }
  0x2c   :  { %1111 = vmatprep.subr.bf16.mxu0 %v1110_v1 }
  0x2f   :  { %1113 = vmatpush3.bf16.msra.mxu0 %v1110_v1 }
  0x30   :  { %1115 = vmatprep.subr.bf16.mxu0 %v1114_v4 }
  0x32   :  { %1023 = vmatmul.mubr.msk.bf16.gmra.mrb[4].mxu0 %vm103_vm0, %v54_v47 }
  0x33   :  { %1026 = vmatprep.mubr.msk.bf16.mxu0 %vm103_vm0, %v55_v48  ;;  %1117 = vmatpush3.bf16.msra.mxu0 %v1114_v4 }
  0x3a   :  { %1027 = vmatmul.mubr.msk.bf16.gmra.mrb[8].mxu0 %vm103_vm0, %v56_v53 }
  0x3b   :  { %1030 = vmatprep.mubr.msk.bf16.mxu0 %vm103_vm0, %v57_v54 }
  0x42   :  { %1031 = vmatmul.mubr.msk.bf16.gmra.mrb[12].mxu0 %vm103_vm0, %v58_v57 }
  0xfd   :  { %v1020_v6 = vpop.f32.mrb[0].mxu0 }
  0xfe   :  { %v367_v7 = vadd.f32 %v1020_v6, %v907_v5  ;;  %v295_v8 = vpop.f32.mrb[1].mxu0 }
  0xff   :  { %v365_v9 = vadd.f32 %v907_v5, %v295_v8  ;;  %v1021_v10 = vpop.f32.mrb[2].mxu0 }
 0x100   :  { %v368_v11 = vadd.f32 %v1021_v10, %v907_v5  ;;  %v298_v12 = vpop.f32.mrb[3].mxu0  ;;  %v383_v14 = vmax.f32 %v367_v7, 0.0 }
 0x101   :  { %v366_v13 = vadd.f32 %v907_v5, %v298_v12  ;;  %v381_v16 = vmax.f32 %v365_v9, 0.0 }
 0x102   :  { %v384_v15 = vmax.f32 %v368_v11, 0.0 }
 0x103   :  { %v382_v17 = vmax.f32 %v366_v13, 0.0 }
 0x104   :  { %v398_v18 = vpack.c.bf16 %v384_v15, %v383_v14 }
 0x105   :  { %v1024_v19 = vpop.f32.mrb[4].mxu0  ;;  %v397_v20 = vpack.c.bf16 %v382_v17, %v381_v16 }
 0x106   :  { %v371_v21 = vadd.f32 %v1024_v19, %v907_v5  ;;  %v311_v22 = vpop.f32.mrb[5].mxu0 }
 0x107   :  { %v369_v23 = vadd.f32 %v907_v5, %v311_v22  ;;  %v1025_v24 = vpop.f32.mrb[6].mxu0  ;;  %1050 = vmatprep.mubr.bf16.mxu1 %v397_v20 }
 0x108   :  { %v372_v25 = vadd.f32 %v1025_v24, %v907_v5  ;;  %v314_v26 = vpop.f32.mrb[7].mxu0  ;;  %1051 = vmatmul.mubr.bf16.vlgmr.msra.gmra.mrb[0].mxu1 %v398_v18  ;;  %v387_v28 = vmax.f32 %v371_v21, 0.0 }
 0x109   :  { %v370_v27 = vadd.f32 %v907_v5, %v314_v26  ;;  %1126 = vmatpush3.bf16.msra.mxu1 %v1106_v63  ;;  %v385_v30 = vmax.f32 %v369_v23, 0.0  ;;  %v596_v63 = vld [vmem:[%s1490_s7 + $0x38] sm:$0xff] }
 0x10a   :  { %v388_v29 = vmax.f32 %v372_v25, 0.0  ;;  %1123 = vmatprep.subr.bf16.mxu1 %v1110_v1  ;;  %v1118_v0 = vpack.c.bf16 %v596_v63, %v595_v62 }
 0x10b   :  { %v386_v31 = vmax.f32 %v370_v27, 0.0 }
 0x10c   :  { %v400_v32 = vpack.c.bf16 %v388_v29, %v387_v28  ;;  %1119 = vmatprep.subr.bf16.mxu0 %v1118_v0 }
 0x10d   :  { %v399_v33 = vpack.c.bf16 %v386_v31, %v385_v30  ;;  %v1028_v34 = vpop.f32.mrb[8].mxu0  ;;  %1127 = vmatpush3.bf16.msra.mxu1 %v1110_v1  ;;  %1121 = vmatpush3.bf16.msra.mxu0 %v1118_v0  ;;  %v908_v1 = vld [vmem:[%s1489_s6] ss:$0 sm:$0xff] }
 0x10e   :  { %v375_v35 = vadd.f32 %v1028_v34, %v907_v5  ;;  %v327_v36 = vpop.f32.mrb[9].mxu0  ;;  %1124 = vmatprep.subr.bf16.mxu1 %v1114_v4 }
 0x10f   :  { %v373_v37 = vadd.f32 %v907_v5, %v327_v36  ;;  %v1029_v38 = vpop.f32.mrb[10].mxu0  ;;  %1054 = vmatprep.mubr.bf16.mxu1 %v399_v33 }
 0x110   :  { %v376_v39 = vadd.f32 %v1029_v38, %v907_v5  ;;  %v330_v40 = vpop.f32.mrb[11].mxu0  ;;  %1055 = vmatmul.mubr.bf16.gmra.mrb[4].mxu1 %v400_v32  ;;  %v391_v42 = vmax.f32 %v375_v35, 0.0 }
 0x111   :  { %v374_v41 = vadd.f32 %v907_v5, %v330_v40  ;;  %1128 = vmatpush3.bf16.msra.mxu1 %v1114_v4  ;;  %v389_v44 = vmax.f32 %v373_v37, 0.0 }
 0x112   :  { %v392_v43 = vmax.f32 %v376_v39, 0.0  ;;  %1125 = vmatprep.subr.bf16.mxu1 %v1118_v0 }
 0x113   :  { %v390_v45 = vmax.f32 %v374_v41, 0.0 }
 0x114   :  { %v402_v46 = vpack.c.bf16 %v392_v43, %v391_v42 }
 0x115   :  { %v401_v47 = vpack.c.bf16 %v390_v45, %v389_v44  ;;  %v1032_v48 = vpop.f32.mrb[12].mxu0  ;;  %1129 = vmatpush3.bf16.msra.mxu1 %v1118_v0 }
 0x116   :  { %v379_v49 = vadd.f32 %v1032_v48, %v907_v5  ;;  %v343_v50 = vpop.f32.mrb[13].mxu0 }
 0x117   :  { %v377_v51 = vadd.f32 %v907_v5, %v343_v50  ;;  %v1033_v52 = vpop.f32.mrb[14].mxu0  ;;  %1058 = vmatprep.mubr.bf16.mxu1 %v401_v47  ;;  %v791_v50 = vlaneseq }
 0x118   :  { %v380_v53 = vadd.f32 %v1033_v52, %v907_v5  ;;  %v346_v54 = vpop.f32.mrb[15].mxu0  ;;  %1059 = vmatmul.mubr.bf16.gmra.mrb[8].mxu1 %v402_v46  ;;  %v395_v56 = vmax.f32 %v379_v49, 0.0 }
 0x119   :  { %v378_v55 = vadd.f32 %v907_v5, %v346_v54  ;;  %v393_v58 = vmax.f32 %v377_v51, 0.0  ;;  %v1432_v51 = vshrl.u32 %v791_v50, 7 }
 0x11a   :  { %v396_v57 = vmax.f32 %v380_v53, 0.0  ;;  %v1435_v53 = vand.u32 127, %v791_v50 }
 0x11b   :  { %v394_v59 = vmax.f32 %v378_v55, 0.0  ;;  %v793_v52 = vadd.s32 8, %v1432_v51  ;;  %v794_v54 = vadd.s32 16, %v1432_v51  ;;  %v797_v0 = vadd.s32 40, %v1432_v51 }
 0x11c   :  { %v404_v60 = vpack.c.bf16 %v396_v57, %v395_v56  ;;  %vm810_vm3 = vcmp.eq.s32.totalorder %v1432_v51, %v1435_v53 }
 0x11d   :  { %v403_v61 = vpack.c.bf16 %v394_v59, %v393_v58  ;;  %vm811_vm2 = vcmp.eq.s32.totalorder %v793_v52, %v1435_v53  ;;  %v795_v58 = vadd.s32 24, %v1432_v51  ;;  %vm812_vm4 = vcmp.eq.s32.totalorder %v794_v54, %v1435_v53 }
 0x11e   :  { %vm815_vm7 = vcmp.eq.s32.totalorder %v797_v0, %v1435_v53 }
 0x11f   :  { %1062 = vmatprep.mubr.bf16.mxu1 %v403_v61  ;;  %v796_v61 = vadd.s32 32, %v1432_v51  ;;  %vm813_vm5 = vcmp.eq.s32.totalorder %v795_v58, %v1435_v53 }
 0x120   :  { %1063 = vmatmul.mubr.bf16.gmra.mrb[12].mxu1 %v404_v60 }
 0x121   :  { %vm814_vm6 = vcmp.eq.s32.totalorder %v796_v61, %v1435_v53 }
 0x1db   :  { %v1052_v2 = vpop.f32.mrb[0].mxu1 }
 0x1dc   :  { %v510_v3 = vpop.f32.mrb[1].mxu1  ;;  %v519_v6 = vadd.f32 %v1052_v2, %v908_v1 }
 0x1dd   :  { %v511_v4 = vadd.f32 %v908_v1, %v510_v3  ;;  %v1053_v5 = vpop.f32.mrb[2].mxu1 }
 0x1de   :  { %v513_v7 = vpop.f32.mrb[3].mxu1  ;;  %v522_v10 = vadd.f32 %v1053_v5, %v908_v1  ;;  %v575_v12 = vmax.f32 %v519_v6, 0.0 }
 0x1df   :  { %v573_v8 = vmax.f32 %v511_v4, 0.0  ;;  %v514_v9 = vadd.f32 %v908_v1, %v513_v7  ;;  %v798_v4 = vadd.s32 48, %v1432_v51 }
 0x1e0   :  { %v576_v16 = vmax.f32 %v522_v10, 0.0 }
 0x1e1   :  { %v574_v11 = vmax.f32 %v514_v9, 0.0  ;;  %1082 = vmatprep.mubr.msk.f32.mxu0 %vm597_vm1, %v573_v8  ;;  %v799_v8 = vadd.s32 56, %v1432_v51  ;;  %vm816_vm8 = vcmp.eq.s32.totalorder %v798_v4, %v1435_v53 }
 0x1e3   :  { %v1056_v13 = vpop.f32.mrb[4].mxu1  ;;  %1083 = vmatmul.mubr.msk.f32.vlgmr.msra.gmra.mrb[16].mxu0 %vm597_vm1, %v574_v11  ;;  %vm817_vm9 = vcmp.eq.s32.totalorder %v799_v8, %v1435_v53 }
 0x1e4   :  { %v535_v14 = vadd.f32 %v1056_v13, %v908_v1  ;;  %v526_v15 = vpop.f32.mrb[5].mxu1  ;;  %1085 = vmatprep.mubr.msk.f32.mxu0 %vm597_vm1, %v575_v12  ;;  %v800_v13 = vadd.s32 64, %v1432_v51 }
 0x1e5   :  { %v527_v17 = vadd.f32 %v908_v1, %v526_v15  ;;  %v1057_v18 = vpop.f32.mrb[6].mxu1 }
 0x1e6   :  { %v579_v19 = vmax.f32 %v535_v14, 0.0  ;;  %v538_v20 = vadd.f32 %v1057_v18, %v908_v1  ;;  %v529_v21 = vpop.f32.mrb[7].mxu1  ;;  %vm818_vm10 = vcmp.eq.s32.totalorder %v800_v13, %v1435_v53 }
 0x1e7   :  { %v577_v22 = vmax.f32 %v527_v17, 0.0  ;;  %v530_v23 = vadd.f32 %v908_v1, %v529_v21  ;;  %1086 = vmatmul.mubr.msk.f32.gmra.mrb[18].mxu0 %vm597_vm1, %v576_v16  ;;  %v801_v16 = vadd.s32 72, %v1432_v51 }
 0x1e8   :  { %v580_v24 = vmax.f32 %v538_v20, 0.0  ;;  %1091 = vmatprep.mubr.msk.f32.mxu1 %vm597_vm1, %v579_v19  ;;  %v802_v19 = vadd.s32 80, %v1432_v51 }
 0x1e9   :  { %v578_v25 = vmax.f32 %v530_v23, 0.0  ;;  %1088 = vmatprep.mubr.msk.f32.mxu0 %vm597_vm1, %v577_v22  ;;  %vm819_vm11 = vcmp.eq.s32.totalorder %v801_v16, %v1435_v53 }
 0x1ea   :  { %1092 = vmatmul.mubr.msk.f32.vlgmr.msra.gmra.mrb[16].mxu1 %vm597_vm1, %v580_v24  ;;  %v803_v24 = vadd.s32 88, %v1432_v51  ;;  %vm820_vm12 = vcmp.eq.s32.totalorder %v802_v19, %v1435_v53 }
 0x1eb   :  { %v1060_v26 = vpop.f32.mrb[8].mxu1  ;;  %1089 = vmatmul.mubr.msk.f32.gmra.mrb[20].mxu0 %vm597_vm1, %v578_v25 }
 0x1ec   :  { %v542_v27 = vpop.f32.mrb[9].mxu1  ;;  %v551_v30 = vadd.f32 %v1060_v26, %v908_v1  ;;  %vm821_vm13 = vcmp.eq.s32.totalorder %v803_v24, %v1435_v53 }
 0x1ed   :  { %v543_v28 = vadd.f32 %v908_v1, %v542_v27  ;;  %v1061_v29 = vpop.f32.mrb[10].mxu1  ;;  %v804_v27 = vadd.s32 96, %v1432_v51 }
 0x1ee   :  { %v545_v31 = vpop.f32.mrb[11].mxu1  ;;  %v554_v34 = vadd.f32 %v1061_v29, %v908_v1  ;;  %v583_v36 = vmax.f32 %v551_v30, 0.0 }
 0x1ef   :  { %v581_v32 = vmax.f32 %v543_v28, 0.0  ;;  %v546_v33 = vadd.f32 %v908_v1, %v545_v31  ;;  %vm822_vm14 = vcmp.eq.s32.totalorder %v804_v27, %v1435_v53 }
 0x1f0   :  { %v584_v39 = vmax.f32 %v554_v34, 0.0 }
 0x1f1   :  { %v582_v35 = vmax.f32 %v546_v33, 0.0  ;;  %1094 = vmatprep.mubr.msk.f32.mxu1 %vm597_vm1, %v581_v32  ;;  %v805_v32 = vadd.s32 104, %v1432_v51 }
 0x1f3   :  { %v1064_v37 = vpop.f32.mrb[12].mxu1  ;;  %1095 = vmatmul.mubr.msk.f32.gmra.mrb[18].mxu1 %vm597_vm1, %v582_v35  ;;  %v806_v35 = vadd.s32 112, %v1432_v51  ;;  %vm823_vm15 = vcmp.eq.s32.totalorder %v805_v32, %v1435_v53 }
 0x1f4   :  { %v558_v38 = vpop.f32.mrb[13].mxu1  ;;  %1097 = vmatprep.mubr.msk.f32.mxu1 %vm597_vm1, %v583_v36  ;;  %v567_v42 = vadd.f32 %v1064_v37, %v908_v1 }
 0x1f5   :  { %v559_v40 = vadd.f32 %v908_v1, %v558_v38  ;;  %v1065_v41 = vpop.f32.mrb[14].mxu1  ;;  %vm824_vm0 = vcmp.eq.s32.totalorder %v806_v35, %v1435_v53 }
 0x1f6   :  { %v561_v43 = vpop.f32.mrb[15].mxu1  ;;  %v570_v46 = vadd.f32 %v1065_v41, %v908_v1  ;;  %v587_v48 = vmax.f32 %v567_v42, 0.0 }
 0x1f7   :  { %v585_v44 = vmax.f32 %v559_v40, 0.0  ;;  %v562_v45 = vadd.f32 %v908_v1, %v561_v43  ;;  %1098 = vmatmul.mubr.msk.f32.gmra.mrb[20].mxu1 %vm597_vm1, %v584_v39  ;;  %v807_v40 = vadd.s32 120, %v1432_v51  ;;  %v864_v51 = vstv %s1491_s8 }
 0x1f8   :  { %v588_v49 = vmax.f32 %v570_v46, 0.0 }
 0x1f9   :  { %v586_v47 = vmax.f32 %v562_v45, 0.0  ;;  %1100 = vmatprep.mubr.msk.f32.mxu1 %vm597_vm1, %v585_v44 }
 0x1fb   :  { %1101 = vmatmul.mubr.msk.f32.gmra.mrb[22].mxu1 %vm597_vm1, %v586_v47 }
 0x1fc   :  { %1103 = vmatprep.mubr.msk.f32.mxu1 %vm597_vm1, %v587_v48 }
 0x1ff   :  { %1104 = vmatmul.mubr.msk.f32.gmra.mrb[24].mxu1 %vm597_vm1, %v588_v49  ;;  %vm825_vm1 = vcmp.eq.s32.totalorder %v807_v40, %v1435_v53 }
 0x2b6   :  { %v1084_v55 = vpop.f32.mrb[16].mxu0 }
 0x2b7   :  { %v827_v56 = vsel %vm811_vm2, %v1084_v55, 0.0  ;;  %v712_v57 = vpop.f32.mrb[17].mxu0 }
 0x2b8   :  { %v826_v59 = vsel %vm810_vm3, %v712_v57, 0.0 }
 0x2b9   :  { %v842_v60 = vadd.f32 %v827_v56, %v826_v59 }
 0x2ba   :  { %v1087_v62 = vpop.f32.mrb[18].mxu0 }
 0x2bb   :  { %v722_v63 = vpop.f32.mrb[19].mxu0  ;;  %v829_v5 = vsel %vm813_vm5, %v1087_v62, 0.0 }
 0x2bc   :  { %v828_v1 = vsel %vm812_vm4, %v722_v63, 0.0 }
 0x2bd   :  { %v843_v2 = vadd.f32 %v842_v60, %v828_v1  ;;  %v1093_v3 = vpop.f32.mrb[16].mxu1 }
 0x2be   :  { %v1090_v6 = vpop.f32.mrb[20].mxu0  ;;  %v742_v7 = vpop.f32.mrb[17].mxu1  ;;  %v833_v20 = vsel %vm817_vm9, %v1093_v3, 0.0 }
 0x2bf   :  { %v732_v9 = vpop.f32.mrb[21].mxu0  ;;  %v844_v10 = vadd.f32 %v843_v2, %v829_v5  ;;  %v831_v14 = vsel %vm815_vm7, %v1090_v6, 0.0  ;;  %v832_v17 = vsel %vm816_vm8, %v742_v7, 0.0 }
 0x2c0   :  { %v830_v11 = vsel %vm814_vm6, %v732_v9, 0.0 }
 0x2c1   :  { %v845_v12 = vadd.f32 %v844_v10, %v830_v11 }
 0x2c3   :  { %v846_v15 = vadd.f32 %v845_v12, %v831_v14 }
 0x2c5   :  { %v847_v18 = vadd.f32 %v846_v15, %v832_v17 }
 0x2c6   :  { %v1096_v21 = vpop.f32.mrb[18].mxu1 }
 0x2c7   :  { %v752_v22 = vpop.f32.mrb[19].mxu1  ;;  %v848_v23 = vadd.f32 %v847_v18, %v833_v20  ;;  %v835_v28 = vsel %vm819_vm11, %v1096_v21, 0.0 }
 0x2c8   :  { %v834_v25 = vsel %vm818_vm10, %v752_v22, 0.0 }
 0x2c9   :  { %v849_v26 = vadd.f32 %v848_v23, %v834_v25 }
 0x2ca   :  { %v1099_v29 = vpop.f32.mrb[20].mxu1 }
 0x2cb   :  { %v762_v30 = vpop.f32.mrb[21].mxu1  ;;  %v850_v31 = vadd.f32 %v849_v26, %v835_v28  ;;  %v837_v36 = vsel %vm821_vm13, %v1099_v29, 0.0 }
 0x2cc   :  { %v836_v33 = vsel %vm820_vm12, %v762_v30, 0.0 }
 0x2cd   :  { %v851_v34 = vadd.f32 %v850_v31, %v836_v33 }
 0x2ce   :  { %v1102_v37 = vpop.f32.mrb[22].mxu1 }
 0x2cf   :  { %v772_v38 = vpop.f32.mrb[23].mxu1  ;;  %v852_v39 = vadd.f32 %v851_v34, %v837_v36  ;;  %v839_v43 = vsel %vm823_vm15, %v1102_v37, 0.0 }
 0x2d0   :  { %v838_v41 = vsel %vm822_vm14, %v772_v38, 0.0 }
 0x2d1   :  { %v853_v42 = vadd.f32 %v852_v39, %v838_v41 }
 0x2d2   :  { %v1105_v44 = vpop.f32.mrb[24].mxu1 }
 0x2d3   :  { %v782_v45 = vpop.f32.mrb[25].mxu1  ;;  %v854_v46 = vadd.f32 %v853_v42, %v839_v43  ;;  %v841_v49 = vsel %vm825_vm1, %v1105_v44, 0.0 }
 0x2d4   :  { %v840_v47 = vsel %vm824_vm0, %v782_v45, 0.0 }
 0x2d5   :  { %v855_v48 = vadd.f32 %v854_v46, %v840_v47 }
 0x2d7   :  { %v856_v50 = vadd.f32 %v855_v48, %v841_v49 }
 0x2d9   :  { %v857_v52 = vrot.slane %v856_v50, 4 }
 0x2db   :  { %v858_v54 = vadd.f32 %v857_v52, %v856_v50 }
 0x2dd   :  { %v859_v55 = vrot.slane %v858_v54, 2 }
 0x2df   :  { %v860_v56 = vadd.f32 %v859_v55, %v858_v54 }
 0x2e1   :  { %v861_v57 = vrot.slane %v860_v56, 1 }
 0x2e3   :  { %v862_v58 = vadd.f32 %v861_v57, %v860_v56 }
 0x2e5   :  { %v865_v59 = vadd.f32 %v864_v51, %v862_v58 }
 0x2e7   :  { %v933_v60 = vmul.f32 -1.442695, %v865_v59 }
 0x2e9   :  { %1159 = vpow2.f32 %v933_v60 }
 0x2f3   :  { %v1160_v53 = vpop.eup %1159 }
 0x2f4   :  { %v869_v61 = vadd.f32 1.0, %v1160_v53 }
 0x2f6   :  { %1161 = vrcp.f32 %v869_v61 }
 0x300   :  { %v1162_v62 = vpop.eup %1161 }
 0x301   :  { %872 = vst [vmem:[#allocation3] sm:$0x1] %v1162_v62 }
 0x302   :  { %1174 = shalt.err (!%p1171_p4)
}
 0x303   :  { %s1175_s23 = scalar_lea.hbm %s1492_s9, 16 }
 0x304   :  { %p1176_p5 = scmp.ne.s32.totalorder %s1492_s9, %s1175_s23  ;;  %p1179_p6 = scmp.lt.u32.totalorder %s1175_s23, %s1492_s9 }
 0x306   :  { %p1181_p7 = pnand %p1179_p6, %p1176_p5 }
 0x308   :  { %1184 = shalt.err (!%p1181_p7)
}
 0x309   :  { %882 = dma.vmem_to_hbm [thread:$0]  %s880_s20, 16, %s1492_s9, [#allocation4]  }
 0x30a   :  { %1185 = dma.done.wait [#allocation4], 16  }
 0x30b   :  { %1186 = vsyncadd [#allocation4], 4294967280 }
 0x30c   :  { %886 = vsyncpa [#allocation4], 1 }

</bundles_post_ra>
